<compile_context>
chip_gen: v7x
topology: tpu7x:2x2x1
jax: 0.10.0
libtpu: 0.0.40
codegen_flags: <defaults>
</compile_context>

<pallas_src>
import jax
import jax.numpy as jnp
from jax.experimental import pallas as pl
from jax.experimental.pallas import tpu as pltpu


def _swish_kernel(beta_ref, x_ref, o_ref):
    # Elementwise hot path. HBM-bound, so the VPU/EUP work is free filler.
    beta = beta_ref[0]                      # f32 scalar from SMEM
    x = x_ref[...].astype(jnp.float32)
    # swish(x) = x * sigmoid(beta*x) = x * 0.5 * (1 + tanh(0.5*beta*x))
    y = x * (0.5 * (1.0 + jnp.tanh((0.5 * beta) * x)))
    o_ref[...] = y.astype(o_ref.dtype)


def _round_up(a, m):
    return ((a + m - 1) // m) * m


def swish(x, beta=1.0, *, target_tile_bytes=8 * 1024 * 1024):
    """Apply Swish activation elementwise. x: any shape (e.g. NCHW)."""
    orig_shape = x.shape
    dtype = x.dtype
    itemsize = jnp.dtype(dtype).itemsize
    n = x.size
    if n == 0:
        return x

    lane = 128
    # Sublane packing: 8 rows/vreg at 32-bit, 16 at 16-bit, 32 at 8-bit.
    sub = max(8, 32 // max(1, itemsize))

    flat = x.reshape(-1)
    rows = pl.cdiv(n, lane)
    lane_aligned = (rows * lane == n)
    if not lane_aligned:
        # Only the (rare) non-128-aligned remainder is padded -- at most 127
        # elements.  Row-block raggedness is handled inside the kernel grid.
        flat = jnp.pad(flat, (0, rows * lane - n))
    x2d = flat.reshape(rows, lane)

    # ~8 MiB per buffer per grid step: keeps per-step overhead negligible on
    # all generations while 2x-double-buffered in+out stays ~32 MiB of VMEM.
    target_rows = _round_up(max(sub, target_tile_bytes // (lane * itemsize)), sub)

    if rows <= target_rows:
        grid_steps = 1
        tile_rows = _round_up(rows, sub)
    else:
        grid_steps = pl.cdiv(rows, target_rows)
        if grid_steps % 2:
            grid_steps += 1  # equal tile counts for the two v7x TensorCores
        tile_rows = _round_up(pl.cdiv(rows, grid_steps), sub)
        grid_steps = pl.cdiv(rows, tile_rows)  # partial last block is fine

    beta_arr = jnp.asarray([beta], dtype=jnp.float32)

    out2d = pl.pallas_call(
        _swish_kernel,
        out_shape=jax.ShapeDtypeStruct((rows, lane), dtype),
        grid_spec=pltpu.PrefetchScalarGridSpec(
            num_scalar_prefetch=1,
            grid=(grid_steps,),
            in_specs=[pl.BlockSpec((tile_rows, lane), lambda i, beta_ref: (i, 0))],
            out_specs=pl.BlockSpec((tile_rows, lane), lambda i, beta_ref: (i, 0)),
        ),
        compiler_params=pltpu.CompilerParams(
            dimension_semantics=("parallel",),
            # 32 MiB of block buffers + headroom; safe on v7x's 64 MiB VMEM.
            vmem_limit_bytes=48 * 1024 * 1024,
        ),
    )(beta_arr, x2d)

    if lane_aligned:
        return out2d.reshape(orig_shape)
    return out2d.reshape(-1)[:n].reshape(orig_shape)


if __name__ == "__main__":
    key = jax.random.PRNGKey(0)

    # 1) NCHW input (PyTorch convention): lane-aligned fast path, single block.
    x = jax.random.normal(key, (2, 4, 16, 16), dtype=jnp.float32)
    out = jax.block_until_ready(swish(x, beta=1.0))
    ref = x * jax.nn.sigmoid(1.0 * x)
    assert out.shape == x.shape
    assert jnp.allclose(out, ref, atol=1e-5, rtol=1e-5)

    # 2) Ragged flat size (not a multiple of 128): minimal-pad path.
    x2 = jax.random.normal(jax.random.PRNGKey(1), (3, 5, 7), dtype=jnp.float32)
    out2 = jax.block_until_ready(swish(x2, beta=0.75))
    ref2 = x2 * jax.nn.sigmoid(0.75 * x2)
    assert out2.shape == x2.shape
    assert jnp.allclose(out2, ref2, atol=1e-5, rtol=1e-5)

    # 3) Multi-step grid with a partial last row-block (no pad, no slice):
    #    shrink the tile target so a small array still exercises the path.
    x3 = jax.random.normal(jax.random.PRNGKey(2), (4, 25, 128), dtype=jnp.float32)
    out3 = jax.block_until_ready(swish(x3, beta=1.5, target_tile_bytes=16 * 1024))
    ref3 = x3 * jax.nn.sigmoid(1.5 * x3)
    assert out3.shape == x3.shape
    assert jnp.allclose(out3, ref3, atol=1e-5, rtol=1e-5)

    # 4) bf16 input: f32 compute inside the kernel, cast back on store.
    x4 = jax.random.normal(jax.random.PRNGKey(3), (2, 3, 64), dtype=jnp.bfloat16)
    out4 = jax.block_until_ready(swish(x4, beta=1.0))
    x4f = x4.astype(jnp.float32)
    ref4 = (x4f * jax.nn.sigmoid(x4f)).astype(jnp.bfloat16)
    assert out4.shape == x4.shape
    assert out4.dtype == jnp.bfloat16
    assert jnp.allclose(out4.astype(jnp.float32), ref4.astype(jnp.float32),
                        atol=2e-2, rtol=2e-2)

    print("KERNEL_OK")
</pallas_src>

<mosaic_0001>
module attributes {stable_mosaic.version = 11 : i64} {
  func.func @_swish_kernel(%arg0: i32, %arg1: memref<1xf32, #tpu.memory_space<smem>>, %arg2: memref<16x128xf32, #tpu.memory_space<vmem>>, %arg3: memref<16x128xf32, #tpu.memory_space<vmem>>) attributes {dimension_semantics = [#tpu.dimension_semantics<parallel>], iteration_bounds = array<i64: 1>, scalar_prefetch = 1 : i64, scratch_operands = 0 : i64, tpu.core_type = #tpu.core_type<tc>, window_params = [{transform_indices = @transform_0, window_bounds = array<i64: 16, 128>}, {transform_indices = @transform_1, window_bounds = array<i64: 16, 128>}]} {
    %c0 = arith.constant 0 : index
    %0 = memref.load %arg1[%c0] : memref<1xf32, #tpu.memory_space<smem>>
    %c0_0 = arith.constant 0 : index
    %c0_1 = arith.constant 0 : index
    %1 = vector.load %arg2[%c0_0, %c0_1] : memref<16x128xf32, #tpu.memory_space<vmem>>, vector<16x128xf32>
    %cst = arith.constant 5.000000e-01 : f32
    %2 = arith.mulf %cst, %0 : f32
    %3 = vector.broadcast %2 : f32 to vector<16x128xf32>
    %4 = arith.mulf %3, %1 : vector<16x128xf32>
    %5 = math.tanh %4 : vector<16x128xf32>
    %cst_2 = arith.constant 1.000000e+00 : f32
    %6 = vector.broadcast %cst_2 : f32 to vector<16x128xf32>
    %7 = arith.addf %6, %5 : vector<16x128xf32>
    %cst_3 = arith.constant 5.000000e-01 : f32
    %8 = vector.broadcast %cst_3 : f32 to vector<16x128xf32>
    %9 = arith.mulf %8, %7 : vector<16x128xf32>
    %10 = arith.mulf %1, %9 : vector<16x128xf32>
    %c0_4 = arith.constant 0 : index
    %c0_5 = arith.constant 0 : index
    %11 = vector.load %arg3[%c0_4, %c0_5] : memref<16x128xf32, #tpu.memory_space<vmem>>, vector<16x128xf32>
    tpu.vector_store %arg3[%c0_4, %c0_5], %10 {strides = array<i32>} : memref<16x128xf32, #tpu.memory_space<vmem>>, vector<16x128xf32>,
    return
  }
  func.func @transform_0(%arg0: i32, %arg1: memref<1xf32, #tpu.memory_space<smem>>) -> (i32, i32) {
    %c0_i32 = arith.constant 0 : i32
    %c0_i32_0 = arith.constant 0 : i32
    return %arg0, %c0_i32 : i32, i32
  }
  func.func @transform_1(%arg0: i32, %arg1: memref<1xf32, #tpu.memory_space<smem>>) -> (i32, i32) {
    %c0_i32 = arith.constant 0 : i32
    %c0_i32_0 = arith.constant 0 : i32
    return %arg0, %c0_i32 : i32, i32
  }
}

</mosaic_0001>

<bundles_post_ra>
// kernel: tpu_custom_call.1
= control target key start
LH: loop header
LB: loop body
LE: loop exit
PB: predicated region body
PF: predicated region fallthrough
CT: control target
= control target key end

     0   :  { %8 = vsyncpa [#allocation5], 0  ;;  %s167_s0 = inlined_call_operand.<no memory space> [shape: f32[1], index: 0, kind: input, shape index: {}]   ;;  %s168_s1 = inlined_call_operand.hbm [shape: f32[16,128], index: 1, kind: input, shape index: {}]   ;;  %s169_s2 = inlined_call_operand.hbm [shape: f32[16,128], index: 2, kind: output, shape index: {}]  }
   0x1   :  { %9 = vsyncpa [#allocation6], 0  ;;  %s115_s9 = smov [#allocation4]   ;;  %s67_s13 = scalar_lea.hbm %s168_s1, 256 }
   0x2   :  { %s15_s10 = sshll.u32 %s115_s9, 4  ;;  %p68_p0 = scmp.ne.s32.totalorder %s168_s1, %s67_s13  ;;  %s16_s10 = int_to_ptr.vmem [resolvable:$true] %s15_s10 }
   0x3   :  { %p71_p1 = scmp.lt.u32.totalorder %s67_s13, %s168_s1 }
   0x5   :  { %p73_p2 = pnand %p71_p1, %p68_p0 }
   0x7   :  { %76 = shalt.err (!%p73_p2)
}
   0x8   :  { %s77_s18 = scalar_lea.vmem %s16_s10, 256  ;;  %p82_p4 = scmp.lt.s32.totalorder %s16_s10, %s16_s10 }
   0x9   :  { %p78_p3 = scmp.ne.s32.totalorder %s16_s10, %s77_s18  ;;  %p83_p5 = scmp.lt.s32.totalorder %s77_s18, %s77_s18 }
   0xb   :  { %p84_p6 = por %p83_p5, %p82_p4 }
   0xd   :  { %p85_p7 = pnand %p84_p6, %p78_p3 }
   0xf   :  { %88 = shalt.err (!%p85_p7)
}
  0x10   :  { %s116_s19 = smov 128   ;;  %s117_s20 = smov 8  }
  0x11   :  { %21 = dma.hbm_to_vmem [thread:$0]  %s168_s1, 256, %s16_s10, [#allocation5], %s116_s19, %s116_s19, %s117_s20  }
  0x12   :  { %111 = dma.done.wait [#allocation5], 256  }
  0x13   :  { %112 = vsyncadd [#allocation5], 4294967040  ;;  %s28_s25 = smul.f32 0.5, %s167_s0  ;;  %v26_v1 = vld [vmem:[#allocation4] sm:$0xff]  ;;  %v27_v2 = vld [vmem:[#allocation4 + $0x8] sm:$0xff]  ;;  %s118_s26 = smov [#allocation7]  }
  0x14   :  { %s47_s1 = sshll.u32 %s118_s26, 4  ;;  %s48_s1 = int_to_ptr.vmem [resolvable:$true] %s47_s1 }
  0x15   :  { %v29_v0 = vstv %s28_s25  ;;  %s89_s0 = scalar_lea.vmem %s48_s1, 256  ;;  %p94_p9 = scmp.lt.s32.totalorder %s48_s1, %s48_s1 }
  0x16   :  { %v30_v3 = vmul.f32 %v29_v0, %v26_v1  ;;  %v31_v4 = vmul.f32 %v29_v0, %v27_v2  ;;  %p90_p8 = scmp.ne.s32.totalorder %s48_s1, %s89_s0  ;;  %p95_p10 = scmp.lt.s32.totalorder %s89_s0, %s89_s0 }
  0x18   :  { %63 = vtanh.f32 %v30_v3  ;;  %p96_p11 = por %p95_p10, %p94_p9 }
  0x19   :  { %65 = vtanh.f32 %v31_v4 }
  0x1a   :  { %p97_p12 = pnand %p96_p11, %p90_p8 }
  0x22   :  { %v64_v5 = vpop.eup %63 }
  0x23   :  { %v66_v6 = vpop.eup %65  ;;  %v34_v7 = vadd.f32 1.0, %v64_v5 }
  0x24   :  { %v35_v8 = vadd.f32 1.0, %v66_v6 }
  0x25   :  { %v36_v9 = vmul.f32 0.5, %v34_v7 }
  0x26   :  { %v37_v10 = vmul.f32 0.5, %v35_v8 }
  0x27   :  { %v38_v11 = vmul.f32 %v36_v9, %v26_v1 }
  0x28   :  { %v39_v12 = vmul.f32 %v37_v10, %v27_v2 }
  0x29   :  { %40 = vst [vmem:[#allocation7] sm:$0xff] %v38_v11 }
  0x2a   :  { %41 = vst [vmem:[#allocation7 + $0x8] sm:$0xff] %v39_v12 }
  0x2b   :  { %100 = shalt.err (!%p97_p12)
}
  0x2c   :  { %s101_s29 = scalar_lea.hbm %s169_s2, 256 }
  0x2d   :  { %p102_p13 = scmp.ne.s32.totalorder %s169_s2, %s101_s29  ;;  %p105_p0 = scmp.lt.u32.totalorder %s101_s29, %s169_s2 }
  0x2f   :  { %p107_p1 = pnand %p105_p0, %p102_p13 }
  0x31   :  { %110 = shalt.err (!%p107_p1)
}
  0x32   :  { %53 = dma.vmem_to_hbm [thread:$0]  %s48_s1, 256, %s169_s2, [#allocation6], %s116_s19, %s116_s19, %s117_s20  }
  0x33   :  { %113 = dma.done.wait [#allocation6], 256  }
  0x34   :  { %114 = vsyncadd [#allocation6], 4294967040 }
  0x35   :  { %57 = vsyncpa [#allocation5], 1 }
  0x36   :  { %58 = vsyncpa [#allocation6], 1 }

</bundles_post_ra>
